<compile_context>
chip_gen: v5e
topology: v5e:2x2
jax: 0.10.0
libtpu: 0.0.40
codegen_flags: <defaults>
</compile_context>

<pallas_src>
import functools
import math

import jax
import jax.numpy as jnp
from jax.experimental import pallas as pl
from jax.experimental.pallas import tpu as pltpu

_LANES = 128
_SUBLANE_F32 = 8                         # sublane granularity for 32-bit dtypes
_DEFAULT_TILE_BYTES = 4 * 1024 * 1024    # ~4 MiB/buffer  -> ~86% HBM roofline (v5e/v6e)
_V7X_TILE_BYTES = 8 * 1024 * 1024        # bigger tiles amortize 0.35us/step at 3.2 TB/s
_SMALL_INPUT_BYTES = 1 << 20             # below this, skip Pallas (launch overhead wins)


def reluliner_kernel(x_ref, o_ref):
    """out = relu(x) * -1 == -max(x, 0), on one lane-dense VMEM tile (pure VPU)."""
    x = x_ref[...]
    o_ref[...] = -jnp.maximum(x, jnp.zeros((), dtype=x.dtype))


def _round_up(n, m):
    return (n + m - 1) // m * m


def _target_tile_bytes():
    """Generation-aware tile size; bigger tiles on v7x (higher HBM bandwidth)."""
    try:
        info = pltpu.get_tpu_info()
        vmem = getattr(info, "vmem_capacity_bytes", None)
        # v7x exposes 64 MiB VMEM per TensorCore (v5e/v6e: 128 MiB) but has
        # ~2.3x the HBM bandwidth, so larger tiles pay off there.
        if vmem is not None and vmem <= 64 * 1024 * 1024:
            return _V7X_TILE_BYTES
    except Exception:
        pass
    return _DEFAULT_TILE_BYTES


def _reluliner_pallas(x):
    """Lane-dense, tiled Pallas path.  Works for any shape (pads + slices)."""
    orig_shape = x.shape
    total = math.prod(orig_shape)
    itemsize = jnp.dtype(x.dtype).itemsize
    # Sublane packing granularity: 8 rows for 4-byte, 16 for 2-byte, 32 for 1-byte.
    sub = max(_SUBLANE_F32, 32 // max(itemsize, 1))
    row_quantum = sub * _LANES

    # Pad the flattened array to a multiple of (sub * 128) so the slab is
    # lane-dense with an (8,128)-aligned row count -> unmasked vld/vst.
    flat = x.reshape(total)
    padded_total = _round_up(max(total, row_quantum), row_quantum)
    if padded_total != total:
        flat = jnp.pad(flat, (0, padded_total - total))
    rows = padded_total // _LANES
    x2 = flat.reshape(rows, _LANES)

    # Block rows sized to the per-generation tile-byte target.
    tile_bytes = _target_tile_bytes()
    block_rows = max(sub, (tile_bytes // (_LANES * itemsize)) // sub * sub)
    block_rows = min(block_rows, rows)
    grid = (pl.cdiv(rows, block_rows),)

    tile_nbytes = block_rows * _LANES * itemsize
    # Input + output, each double-buffered, plus headroom; stay < v7x physical.
    vmem_limit = int(min(4 * tile_nbytes + (2 << 20), 48 * 1024 * 1024))

    out2 = pl.pallas_call(
        reluliner_kernel,
        out_shape=jax.ShapeDtypeStruct(x2.shape, x2.dtype),
        grid=grid,
        in_specs=[pl.BlockSpec((block_rows, _LANES), lambda i: (i, 0))],
        out_specs=pl.BlockSpec((block_rows, _LANES), lambda i: (i, 0)),
        compiler_params=pltpu.CompilerParams(
            dimension_semantics=("parallel",),
            vmem_limit_bytes=vmem_limit,
        ),
        cost_estimate=pl.CostEstimate(
            flops=2 * padded_total,
            transcendentals=0,
            bytes_accessed=2 * padded_total * itemsize,
        ),
    )(x2)

    out = out2.reshape(padded_total)
    if padded_total != total:
        out = out[:total]
    return out.reshape(orig_shape)


def reluliner_forward(x, *, min_pallas_bytes=_SMALL_INPUT_BYTES):
    """PyTorch Reluliner.forward: relu(x) * -1.

    Tiny inputs bypass Pallas (fixed launch/per-step cost dominates); large
    inputs go through the tiled HBM-streaming Pallas kernel.
    """
    total = math.prod(x.shape)
    if total == 0 or total * jnp.dtype(x.dtype).itemsize < min_pallas_bytes:
        return jnp.maximum(x, 0) * -1
    return _reluliner_pallas(x)


def reference_forward(x):
    """Pure-JAX reference of PyTorch Reluliner: relu(x) * -1."""
    return jax.nn.relu(x) * -1.0


if __name__ == "__main__":
    key = jax.random.PRNGKey(0)
    # Small deterministic input consistent with the module's elementwise
    # forward: (batch=2, channels=4, spatial=16x16).
    x = jax.random.normal(key, (2, 4, 16, 16), jnp.float32)

    # Force the Pallas path even at demo size so the kernel itself runs.
    fwd_pallas = jax.jit(functools.partial(reluliner_forward, min_pallas_bytes=0))
    out = fwd_pallas(x)
    jax.block_until_ready(out)

    ref = reference_forward(x)
    assert out.shape == x.shape
    assert out.dtype == x.dtype
    assert jnp.allclose(out, ref, atol=1e-6, rtol=1e-6)
    # Sanity: outputs are never positive (it is minus a ReLU).
    assert bool(jnp.all(out <= 0.0))

    # Non-128-divisible shape exercises the pad-and-slice path.
    x_odd = jax.random.normal(jax.random.PRNGKey(1), (3, 5, 7), jnp.float32)
    out_odd = jax.jit(functools.partial(reluliner_forward, min_pallas_bytes=0))(x_odd)
    jax.block_until_ready(out_odd)
    assert out_odd.shape == x_odd.shape
    assert jnp.allclose(out_odd, reference_forward(x_odd), atol=1e-6, rtol=1e-6)

    # Default wrapper (small-input XLA bypass) must match as well.
    out_default = jax.jit(reluliner_forward)(x)
    jax.block_until_ready(out_default)
    assert jnp.allclose(out_default, ref, atol=1e-6, rtol=1e-6)

    print("KERNEL_OK")
</pallas_src>

<mosaic_0001>
module attributes {stable_mosaic.version = 11 : i64} {
  func.func @reluliner_kernel(%arg0: i32, %arg1: memref<16x128xf32, #tpu.memory_space<vmem>>, %arg2: memref<16x128xf32, #tpu.memory_space<vmem>>) attributes {dimension_semantics = [#tpu.dimension_semantics<parallel>], iteration_bounds = array<i64: 1>, scalar_prefetch = 0 : i64, scratch_operands = 0 : i64, tpu.core_type = #tpu.core_type<tc>, window_params = [{transform_indices = @transform_0, window_bounds = array<i64: 16, 128>}, {transform_indices = @transform_1, window_bounds = array<i64: 16, 128>}]} {
    %c0 = arith.constant 0 : index
    %c0_0 = arith.constant 0 : index
    %0 = vector.load %arg1[%c0, %c0_0] : memref<16x128xf32, #tpu.memory_space<vmem>>, vector<16x128xf32>
    %cst = arith.constant 0.000000e+00 : f32
    %1 = vector.broadcast %cst : f32 to vector<16x128xf32>
    %2 = arith.maximumf %0, %1 : vector<16x128xf32>
    %cst_1 = arith.constant 0.000000e+00 : f32
    %3 = vector.broadcast %cst_1 : f32 to vector<16x128xf32>
    %4 = arith.subf %3, %2 : vector<16x128xf32>
    %c0_2 = arith.constant 0 : index
    %c0_3 = arith.constant 0 : index
    %5 = vector.load %arg2[%c0_2, %c0_3] : memref<16x128xf32, #tpu.memory_space<vmem>>, vector<16x128xf32>
    tpu.vector_store %arg2[%c0_2, %c0_3], %4 {strides = array<i32>} : memref<16x128xf32, #tpu.memory_space<vmem>>, vector<16x128xf32>,
    return
  }
  func.func @transform_0(%arg0: i32) -> (i32, i32) {
    %c0_i32 = arith.constant 0 : i32
    %c0_i32_0 = arith.constant 0 : i32
    return %arg0, %c0_i32 : i32, i32
  }
  func.func @transform_1(%arg0: i32) -> (i32, i32) {
    %c0_i32 = arith.constant 0 : i32
    %c0_i32_0 = arith.constant 0 : i32
    return %arg0, %c0_i32 : i32, i32
  }
}

</mosaic_0001>

<bundles_post_ra>
// kernel: reluliner_forward.1
= control target key start
LH: loop header
LB: loop body
LE: loop exit
PB: predicated region body
PF: predicated region fallthrough
CT: control target
= control target key end

     0   :  { %s42_s0 = inlined_call_operand.vmem [shape: f32[16,128], index: 0, kind: input, shape index: {}]   ;;  %s43_s1 = inlined_call_operand.vmem [shape: f32[16,128], index: 1, kind: output, shape index: {}]  }
   0x1   :  { %v8_v0 = vld [vmem:[%s42_s0] sm:$0xff]  ;;  %v9_v1 = vld [vmem:[%s42_s0 + $0x8] sm:$0xff] }
   0x2   :  { %v10_v2 = vmax.f32 %v8_v0, 0.0  ;;  %v11_v3 = vmax.f32 %v9_v1, 0.0 }
   0x4   :  { %v12_v4 = vsub.f32 0.0, %v10_v2  ;;  %v13_v5 = vsub.f32 0.0, %v11_v3 }
   0x6   :  { %14 = vst [vmem:[%s43_s1] sm:$0xff] %v12_v4 }
   0x7   :  { %15 = vst [vmem:[%s43_s1 + $0x8] sm:$0xff] %v13_v5 }

</bundles_post_ra>
